<compile_context>
chip_gen: v5e
topology: v5e:2x2
jax: 0.10.0
libtpu: 0.0.40
codegen_flags: <defaults>
</compile_context>

<pallas_src>
import math

import numpy as np
import jax
import jax.numpy as jnp
from jax.experimental import pallas as pl
from jax.experimental.pallas import tpu as pltpu

BN_EPS = 1e-5
LANES = 128

# Per-feature vectors kept in the kernel (biases cancelled by training-mode BN
# are omitted).  Order == row order inside the aligned vector block.
VEC_NAMES = ("b3", "b6", "g1", "t1", "g2", "t2", "g4", "t4", "g5", "t5")


def _round_up(n, m):
    return (n + m - 1) // m * m


def _layer_dims(input_size, hidden_size):
    # encoder: in -> in/2 -> in/4 -> hidden ; decoder: hidden -> in/4 -> in/2 -> in
    return [input_size, input_size // 2, input_size // 4, hidden_size,
            input_size // 4, input_size // 2, input_size]


def _param_layout(input_size, hidden_size):
    """Placement of real parameter blocks inside the packed (rows, 128) buffer.

    Each weight occupies a full, zero-padded (128, 128) tile (tile i starts at
    row i*128).  The encoder output ("code") is kept at lane offset
    `input_size`, so w3/b3 write there and w4 reads from there; this lets the
    final fused output be a plain lane select with no roll/relayout.
    """
    dims = _layer_dims(input_size, hidden_size)
    assert input_size % 4 == 0
    assert max(dims) <= LANES, "this packing assumes every layer width <= 128"
    assert input_size + hidden_size <= LANES, "fused output needs in+hid <= 128"

    enc_off = input_size
    layout = {}
    # (row_start, col_start, n_rows, n_cols) of the REAL block.
    w_row_in_tile = [0, 0, 0, enc_off, 0, 0]   # w4 reads the code at lane offset
    w_col_off     = [0, 0, enc_off, 0, 0, 0]   # w3 writes the code at lane offset
    for i in range(6):
        layout[f"w{i + 1}"] = (i * LANES + w_row_in_tile[i], w_col_off[i],
                               dims[i], dims[i + 1])

    vec_row = 6 * LANES                        # 8-row aligned by construction
    widths = {"b3": dims[3], "b6": dims[6],
              "g1": dims[1], "t1": dims[1],
              "g2": dims[2], "t2": dims[2],
              "g4": dims[4], "t4": dims[4],
              "g5": dims[5], "t5": dims[5]}
    col_off = {"b3": enc_off}                  # b3 lives where the code lives
    for j, name in enumerate(VEC_NAMES):
        layout[name] = (vec_row + j, col_off.get(name, 0), 1, widths[name])

    n_vec_rows = _round_up(len(VEC_NAMES), 8)  # 16: one aligned block load
    total_rows = vec_row + n_vec_rows
    return layout, total_rows, vec_row, n_vec_rows


def pack_params(params, input_size, hidden_size):
    """Pack all kernel-used parameters into one contiguous f32 buffer (host-side, once)."""
    layout, total_rows, _, _ = _param_layout(input_size, hidden_size)
    buf = np.zeros((total_rows, LANES), np.float32)   # zero padding everywhere
    for name, (r, c, nr, nc) in layout.items():
        arr = np.asarray(params[name], dtype=np.float32).reshape(nr, nc)
        buf[r:r + nr, c:c + nc] = arr
    return jnp.asarray(buf)


def _make_kernel(input_size, hidden_size, vec_row, n_vec_rows):
    vidx = {n: i for i, n in enumerate(VEC_NAMES)}

    def kernel(x_ref, p_ref, out_ref):
        # Full 128-row-aligned (128,128) weight tiles; padding lanes/rows are 0.
        def weight(i):                       # i in 1..6
            return p_ref[pl.ds((i - 1) * LANES, LANES), :]

        # All per-feature vectors: one aligned (16,128) load, rows picked
        # in-register (no unaligned single-row ref loads).
        vecs = p_ref[pl.ds(vec_row, n_vec_rows), :]

        def vec(name):
            j = vidx[name]
            return vecs[j:j + 1, :]          # (1, 128)

        def linear(h, i, bname=None):
            out = jnp.dot(h, weight(i), preferred_element_type=jnp.float32)
            if bname is not None:
                out = out + vec(bname)
            return out

        def bn_relu(h, gname, tname):
            # Training-mode BN (biased variance) folded into one per-feature
            # scale + shift; one-pass variance.  gamma/beta are zero in padded
            # lanes, so padded features stay exactly 0 and NaN-free.
            mu = jnp.mean(h, axis=0, keepdims=True)
            ex2 = jnp.mean(h * h, axis=0, keepdims=True)
            var = jnp.maximum(ex2 - mu * mu, 0.0)
            s = vec(gname) * jax.lax.rsqrt(var + BN_EPS)   # (1, 128)
            t = vec(tname) - mu * s                        # (1, 128)
            return jnp.maximum(h * s + t, 0.0)

        x = x_ref[...]                                     # (B, 128), padded lanes 0

        # ---- encoder ----  (b1, b2 omitted: cancelled by training-mode BN)
        h = bn_relu(linear(x, 1), "g1", "t1")
        h = bn_relu(linear(h, 2), "g2", "t2")
        enc = linear(h, 3, "b3")     # code lives in lanes [input_size, input_size+hidden)

        # ---- decoder ----  (b4, b5 omitted: cancelled by training-mode BN)
        h = bn_relu(linear(enc, 4), "g4", "t4")
        h = bn_relu(linear(h, 5), "g5", "t5")
        dec = jax.nn.sigmoid(linear(h, 6, "b6"))   # real in lanes [0, input_size)

        # Fused lane-dense output: dec in [0,input_size), enc in
        # [input_size, input_size+hidden); rest 0.  Single unmasked store.
        lane = jax.lax.broadcasted_iota(jnp.int32, dec.shape, 1)
        out_ref[...] = jnp.where(lane < input_size, dec, enc)

    return kernel


def autoencoder_forward(x, packed_params, input_size, hidden_size):
    """x: (B, input_size) f32.  Returns (encoded (B,hidden), decoded (B,input))."""
    B = x.shape[0]
    _, _, vec_row, n_vec_rows = _param_layout(input_size, hidden_size)

    # Keep activations 128 lanes wide end-to-end (zero-pad the input lanes).
    x_pad = jnp.zeros((B, LANES), jnp.float32).at[:, :input_size].set(x)

    out = pl.pallas_call(
        _make_kernel(input_size, hidden_size, vec_row, n_vec_rows),
        out_shape=jax.ShapeDtypeStruct((B, LANES), jnp.float32),
        in_specs=[
            pl.BlockSpec(memory_space=pltpu.VMEM),   # activations (1 DMA)
            pl.BlockSpec(memory_space=pltpu.VMEM),   # packed parameters (1 DMA)
        ],
        out_specs=pl.BlockSpec(memory_space=pltpu.VMEM),
    )(x_pad, packed_params)

    dec = out[:, :input_size]
    enc = out[:, input_size:input_size + hidden_size]
    return enc, dec


def make_params(key, input_size, hidden_size):
    """Deterministic parameter init mirroring the PyTorch module's layer shapes."""
    dims = _layer_dims(input_size, hidden_size)
    params = {}
    keys = jax.random.split(key, 12)
    for i in range(6):
        fan_in, fan_out = dims[i], dims[i + 1]
        bound = 1.0 / math.sqrt(fan_in)
        params[f"w{i + 1}"] = jax.random.uniform(
            keys[2 * i], (fan_in, fan_out), minval=-bound, maxval=bound,
            dtype=jnp.float32)
        params[f"b{i + 1}"] = jax.random.uniform(
            keys[2 * i + 1], (1, fan_out), minval=-bound, maxval=bound,
            dtype=jnp.float32)
    # BatchNorm affine params after linear layers 1, 2 (encoder) and 4, 5 (decoder)
    for i in (1, 2, 4, 5):
        fan_out = dims[i]
        params[f"g{i}"] = jnp.ones((1, fan_out), jnp.float32)
        params[f"t{i}"] = jnp.zeros((1, fan_out), jnp.float32)
    return params


def reference_forward(x, p):
    """Pure-JAX reference replicating PyTorch training-mode semantics
    (including the redundant pre-BN biases, which cancel mathematically)."""

    def lin(h, w, b):
        return h @ w + b

    def bn_relu(h, g, t):
        mu = jnp.mean(h, axis=0, keepdims=True)
        var = jnp.mean((h - mu) ** 2, axis=0, keepdims=True)
        return jnp.maximum((h - mu) / jnp.sqrt(var + BN_EPS) * g + t, 0.0)

    h = bn_relu(lin(x, p["w1"], p["b1"]), p["g1"], p["t1"])
    h = bn_relu(lin(h, p["w2"], p["b2"]), p["g2"], p["t2"])
    enc = lin(h, p["w3"], p["b3"])
    h = bn_relu(lin(enc, p["w4"], p["b4"]), p["g4"], p["t4"])
    h = bn_relu(lin(h, p["w5"], p["b5"]), p["g5"], p["t5"])
    dec = jax.nn.sigmoid(lin(h, p["w6"], p["b6"]))
    return enc, dec


if __name__ == "__main__":
    input_size = 64
    hidden_size = 10
    batch = 8  # multiple of 8 (sublane tile); whole BN batch in one program

    key = jax.random.PRNGKey(0)
    kx, kp = jax.random.split(key)
    x = jax.random.normal(kx, (batch, input_size), dtype=jnp.float32)
    params = make_params(kp, input_size, hidden_size)

    packed = pack_params(params, input_size, hidden_size)  # packed once, reused

    enc, dec = autoencoder_forward(x, packed, input_size, hidden_size)
    enc, dec = jax.block_until_ready((enc, dec))

    enc_ref, dec_ref = reference_forward(x, params)
    assert enc.shape == (batch, hidden_size) and dec.shape == (batch, input_size)
    assert jnp.allclose(enc, enc_ref, atol=1e-4, rtol=1e-4)
    assert jnp.allclose(dec, dec_ref, atol=1e-4, rtol=1e-4)

    print("KERNEL_OK")
</pallas_src>

<mosaic_0001>
module attributes {stable_mosaic.version = 11 : i64} {
  func.func @kernel(%arg0: memref<8x128xf32, #tpu.memory_space<vmem>>, %arg1: memref<784x128xf32, #tpu.memory_space<vmem>>, %arg2: memref<8x128xf32, #tpu.memory_space<vmem>>) attributes {dimension_semantics = [], scalar_prefetch = 0 : i64, scratch_operands = 0 : i64, tpu.core_type = #tpu.core_type<tc>} {
    %c768 = arith.constant 768 : index
    %c0 = arith.constant 0 : index
    %0 = vector.load %arg1[%c768, %c0] : memref<784x128xf32, #tpu.memory_space<vmem>>, vector<16x128xf32>
    %c0_0 = arith.constant 0 : index
    %c0_1 = arith.constant 0 : index
    %1 = vector.load %arg0[%c0_0, %c0_1] : memref<8x128xf32, #tpu.memory_space<vmem>>, vector<8x128xf32>
    %c0_2 = arith.constant 0 : index
    %c0_3 = arith.constant 0 : index
    %2 = vector.load %arg1[%c0_2, %c0_3] : memref<784x128xf32, #tpu.memory_space<vmem>>, vector<128x128xf32>
    %cst = arith.constant dense<0.000000e+00> : vector<8x128xf32>
    %3 = tpu.matmul %1, %2, %cst {dimension_numbers = #tpu.dot_dimension_numbers<[1], [0], [0], [1], [0, 0, 1, 1], [], []>} : vector<8x128xf32>, vector<128x128xf32>, vector<8x128xf32> -> vector<8x128xf32>
    %cst_4 = arith.constant dense<0.000000e+00> : vector<128xf32>
    %4 = vector.multi_reduction <add>, %3, %cst_4 [0] : vector<8x128xf32> to vector<128xf32>
    %5 = vector.shape_cast %4 : vector<128xf32> to vector<1x128xf32>
    %cst_5 = arith.constant 8.000000e+00 : f32
    %6 = vector.broadcast %cst_5 : f32 to vector<1x128xf32>
    %7 = arith.divf %5, %6 : vector<1x128xf32>
    %8 = arith.mulf %3, %3 : vector<8x128xf32>
    %cst_6 = arith.constant dense<0.000000e+00> : vector<128xf32>
    %9 = vector.multi_reduction <add>, %8, %cst_6 [0] : vector<8x128xf32> to vector<128xf32>
    %10 = vector.shape_cast %9 : vector<128xf32> to vector<1x128xf32>
    %cst_7 = arith.constant 8.000000e+00 : f32
    %11 = vector.broadcast %cst_7 : f32 to vector<1x128xf32>
    %12 = arith.divf %10, %11 : vector<1x128xf32>
    %13 = arith.mulf %7, %7 : vector<1x128xf32>
    %14 = arith.subf %12, %13 : vector<1x128xf32>
    %cst_8 = arith.constant 0.000000e+00 : f32
    %15 = vector.broadcast %cst_8 : f32 to vector<1x128xf32>
    %16 = arith.maximumf %14, %15 : vector<1x128xf32>
    %17 = vector.extract_strided_slice %0 {offsets = [2, 0], sizes = [1, 128], strides = [1, 1]} : vector<16x128xf32> to vector<1x128xf32>
    %cst_9 = arith.constant 9.99999974E-6 : f32
    %18 = vector.broadcast %cst_9 : f32 to vector<1x128xf32>
    %19 = arith.addf %16, %18 : vector<1x128xf32>
    %20 = math.rsqrt %19 : vector<1x128xf32>
    %21 = arith.mulf %17, %20 : vector<1x128xf32>
    %22 = vector.extract_strided_slice %0 {offsets = [3, 0], sizes = [1, 128], strides = [1, 1]} : vector<16x128xf32> to vector<1x128xf32>
    %23 = arith.mulf %7, %21 : vector<1x128xf32>
    %24 = arith.subf %22, %23 : vector<1x128xf32>
    %25 = vector.broadcast %21 : vector<1x128xf32> to vector<8x128xf32>
    %26 = arith.mulf %3, %25 : vector<8x128xf32>
    %27 = vector.broadcast %24 : vector<1x128xf32> to vector<8x128xf32>
    %28 = arith.addf %26, %27 : vector<8x128xf32>
    %cst_10 = arith.constant 0.000000e+00 : f32
    %29 = vector.broadcast %cst_10 : f32 to vector<8x128xf32>
    %30 = arith.maximumf %28, %29 : vector<8x128xf32>
    %c128 = arith.constant 128 : index
    %c0_11 = arith.constant 0 : index
    %31 = vector.load %arg1[%c128, %c0_11] : memref<784x128xf32, #tpu.memory_space<vmem>>, vector<128x128xf32>
    %cst_12 = arith.constant dense<0.000000e+00> : vector<8x128xf32>
    %32 = tpu.matmul %30, %31, %cst_12 {dimension_numbers = #tpu.dot_dimension_numbers<[1], [0], [0], [1], [0, 0, 1, 1], [], []>} : vector<8x128xf32>, vector<128x128xf32>, vector<8x128xf32> -> vector<8x128xf32>
    %cst_13 = arith.constant dense<0.000000e+00> : vector<128xf32>
    %33 = vector.multi_reduction <add>, %32, %cst_13 [0] : vector<8x128xf32> to vector<128xf32>
    %34 = vector.shape_cast %33 : vector<128xf32> to vector<1x128xf32>
    %cst_14 = arith.constant 8.000000e+00 : f32
    %35 = vector.broadcast %cst_14 : f32 to vector<1x128xf32>
    %36 = arith.divf %34, %35 : vector<1x128xf32>
    %37 = arith.mulf %32, %32 : vector<8x128xf32>
    %cst_15 = arith.constant dense<0.000000e+00> : vector<128xf32>
    %38 = vector.multi_reduction <add>, %37, %cst_15 [0] : vector<8x128xf32> to vector<128xf32>
    %39 = vector.shape_cast %38 : vector<128xf32> to vector<1x128xf32>
    %cst_16 = arith.constant 8.000000e+00 : f32
    %40 = vector.broadcast %cst_16 : f32 to vector<1x128xf32>
    %41 = arith.divf %39, %40 : vector<1x128xf32>
    %42 = arith.mulf %36, %36 : vector<1x128xf32>
    %43 = arith.subf %41, %42 : vector<1x128xf32>
    %cst_17 = arith.constant 0.000000e+00 : f32
    %44 = vector.broadcast %cst_17 : f32 to vector<1x128xf32>
    %45 = arith.maximumf %43, %44 : vector<1x128xf32>
    %46 = vector.extract_strided_slice %0 {offsets = [4, 0], sizes = [1, 128], strides = [1, 1]} : vector<16x128xf32> to vector<1x128xf32>
    %cst_18 = arith.constant 9.99999974E-6 : f32
    %47 = vector.broadcast %cst_18 : f32 to vector<1x128xf32>
    %48 = arith.addf %45, %47 : vector<1x128xf32>
    %49 = math.rsqrt %48 : vector<1x128xf32>
    %50 = arith.mulf %46, %49 : vector<1x128xf32>
    %51 = vector.extract_strided_slice %0 {offsets = [5, 0], sizes = [1, 128], strides = [1, 1]} : vector<16x128xf32> to vector<1x128xf32>
    %52 = arith.mulf %36, %50 : vector<1x128xf32>
    %53 = arith.subf %51, %52 : vector<1x128xf32>
    %54 = vector.broadcast %50 : vector<1x128xf32> to vector<8x128xf32>
    %55 = arith.mulf %32, %54 : vector<8x128xf32>
    %56 = vector.broadcast %53 : vector<1x128xf32> to vector<8x128xf32>
    %57 = arith.addf %55, %56 : vector<8x128xf32>
    %cst_19 = arith.constant 0.000000e+00 : f32
    %58 = vector.broadcast %cst_19 : f32 to vector<8x128xf32>
    %59 = arith.maximumf %57, %58 : vector<8x128xf32>
    %c256 = arith.constant 256 : index
    %c0_20 = arith.constant 0 : index
    %60 = vector.load %arg1[%c256, %c0_20] : memref<784x128xf32, #tpu.memory_space<vmem>>, vector<128x128xf32>
    %cst_21 = arith.constant dense<0.000000e+00> : vector<8x128xf32>
    %61 = tpu.matmul %59, %60, %cst_21 {dimension_numbers = #tpu.dot_dimension_numbers<[1], [0], [0], [1], [0, 0, 1, 1], [], []>} : vector<8x128xf32>, vector<128x128xf32>, vector<8x128xf32> -> vector<8x128xf32>
    %62 = vector.extract_strided_slice %0 {offsets = [0, 0], sizes = [1, 128], strides = [1, 1]} : vector<16x128xf32> to vector<1x128xf32>
    %63 = vector.broadcast %62 : vector<1x128xf32> to vector<8x128xf32>
    %64 = arith.addf %61, %63 : vector<8x128xf32>
    %c384 = arith.constant 384 : index
    %c0_22 = arith.constant 0 : index
    %65 = vector.load %arg1[%c384, %c0_22] : memref<784x128xf32, #tpu.memory_space<vmem>>, vector<128x128xf32>
    %cst_23 = arith.constant dense<0.000000e+00> : vector<8x128xf32>
    %66 = tpu.matmul %64, %65, %cst_23 {dimension_numbers = #tpu.dot_dimension_numbers<[1], [0], [0], [1], [0, 0, 1, 1], [], []>} : vector<8x128xf32>, vector<128x128xf32>, vector<8x128xf32> -> vector<8x128xf32>
    %cst_24 = arith.constant dense<0.000000e+00> : vector<128xf32>
    %67 = vector.multi_reduction <add>, %66, %cst_24 [0] : vector<8x128xf32> to vector<128xf32>
    %68 = vector.shape_cast %67 : vector<128xf32> to vector<1x128xf32>
    %cst_25 = arith.constant 8.000000e+00 : f32
    %69 = vector.broadcast %cst_25 : f32 to vector<1x128xf32>
    %70 = arith.divf %68, %69 : vector<1x128xf32>
    %71 = arith.mulf %66, %66 : vector<8x128xf32>
    %cst_26 = arith.constant dense<0.000000e+00> : vector<128xf32>
    %72 = vector.multi_reduction <add>, %71, %cst_26 [0] : vector<8x128xf32> to vector<128xf32>
    %73 = vector.shape_cast %72 : vector<128xf32> to vector<1x128xf32>
    %cst_27 = arith.constant 8.000000e+00 : f32
    %74 = vector.broadcast %cst_27 : f32 to vector<1x128xf32>
    %75 = arith.divf %73, %74 : vector<1x128xf32>
    %76 = arith.mulf %70, %70 : vector<1x128xf32>
    %77 = arith.subf %75, %76 : vector<1x128xf32>
    %cst_28 = arith.constant 0.000000e+00 : f32
    %78 = vector.broadcast %cst_28 : f32 to vector<1x128xf32>
    %79 = arith.maximumf %77, %78 : vector<1x128xf32>
    %80 = vector.extract_strided_slice %0 {offsets = [6, 0], sizes = [1, 128], strides = [1, 1]} : vector<16x128xf32> to vector<1x128xf32>
    %cst_29 = arith.constant 9.99999974E-6 : f32
    %81 = vector.broadcast %cst_29 : f32 to vector<1x128xf32>
    %82 = arith.addf %79, %81 : vector<1x128xf32>
    %83 = math.rsqrt %82 : vector<1x128xf32>
    %84 = arith.mulf %80, %83 : vector<1x128xf32>
    %85 = vector.extract_strided_slice %0 {offsets = [7, 0], sizes = [1, 128], strides = [1, 1]} : vector<16x128xf32> to vector<1x128xf32>
    %86 = arith.mulf %70, %84 : vector<1x128xf32>
    %87 = arith.subf %85, %86 : vector<1x128xf32>
    %88 = vector.broadcast %84 : vector<1x128xf32> to vector<8x128xf32>
    %89 = arith.mulf %66, %88 : vector<8x128xf32>
    %90 = vector.broadcast %87 : vector<1x128xf32> to vector<8x128xf32>
    %91 = arith.addf %89, %90 : vector<8x128xf32>
    %cst_30 = arith.constant 0.000000e+00 : f32
    %92 = vector.broadcast %cst_30 : f32 to vector<8x128xf32>
    %93 = arith.maximumf %91, %92 : vector<8x128xf32>
    %c512 = arith.constant 512 : index
    %c0_31 = arith.constant 0 : index
    %94 = vector.load %arg1[%c512, %c0_31] : memref<784x128xf32, #tpu.memory_space<vmem>>, vector<128x128xf32>
    %cst_32 = arith.constant dense<0.000000e+00> : vector<8x128xf32>
    %95 = tpu.matmul %93, %94, %cst_32 {dimension_numbers = #tpu.dot_dimension_numbers<[1], [0], [0], [1], [0, 0, 1, 1], [], []>} : vector<8x128xf32>, vector<128x128xf32>, vector<8x128xf32> -> vector<8x128xf32>
    %cst_33 = arith.constant dense<0.000000e+00> : vector<128xf32>
    %96 = vector.multi_reduction <add>, %95, %cst_33 [0] : vector<8x128xf32> to vector<128xf32>
    %97 = vector.shape_cast %96 : vector<128xf32> to vector<1x128xf32>
    %cst_34 = arith.constant 8.000000e+00 : f32
    %98 = vector.broadcast %cst_34 : f32 to vector<1x128xf32>
    %99 = arith.divf %97, %98 : vector<1x128xf32>
    %100 = arith.mulf %95, %95 : vector<8x128xf32>
    %cst_35 = arith.constant dense<0.000000e+00> : vector<128xf32>
    %101 = vector.multi_reduction <add>, %100, %cst_35 [0] : vector<8x128xf32> to vector<128xf32>
    %102 = vector.shape_cast %101 : vector<128xf32> to vector<1x128xf32>
    %cst_36 = arith.constant 8.000000e+00 : f32
    %103 = vector.broadcast %cst_36 : f32 to vector<1x128xf32>
    %104 = arith.divf %102, %103 : vector<1x128xf32>
    %105 = arith.mulf %99, %99 : vector<1x128xf32>
    %106 = arith.subf %104, %105 : vector<1x128xf32>
    %cst_37 = arith.constant 0.000000e+00 : f32
    %107 = vector.broadcast %cst_37 : f32 to vector<1x128xf32>
    %108 = arith.maximumf %106, %107 : vector<1x128xf32>
    %109 = vector.extract_strided_slice %0 {offsets = [8, 0], sizes = [1, 128], strides = [1, 1]} : vector<16x128xf32> to vector<1x128xf32>
    %cst_38 = arith.constant 9.99999974E-6 : f32
    %110 = vector.broadcast %cst_38 : f32 to vector<1x128xf32>
    %111 = arith.addf %108, %110 : vector<1x128xf32>
    %112 = math.rsqrt %111 : vector<1x128xf32>
    %113 = arith.mulf %109, %112 : vector<1x128xf32>
    %114 = vector.extract_strided_slice %0 {offsets = [9, 0], sizes = [1, 128], strides = [1, 1]} : vector<16x128xf32> to vector<1x128xf32>
    %115 = arith.mulf %99, %113 : vector<1x128xf32>
    %116 = arith.subf %114, %115 : vector<1x128xf32>
    %117 = vector.broadcast %113 : vector<1x128xf32> to vector<8x128xf32>
    %118 = arith.mulf %95, %117 : vector<8x128xf32>
    %119 = vector.broadcast %116 : vector<1x128xf32> to vector<8x128xf32>
    %120 = arith.addf %118, %119 : vector<8x128xf32>
    %cst_39 = arith.constant 0.000000e+00 : f32
    %121 = vector.broadcast %cst_39 : f32 to vector<8x128xf32>
    %122 = arith.maximumf %120, %121 : vector<8x128xf32>
    %c640 = arith.constant 640 : index
    %c0_40 = arith.constant 0 : index
    %123 = vector.load %arg1[%c640, %c0_40] : memref<784x128xf32, #tpu.memory_space<vmem>>, vector<128x128xf32>
    %cst_41 = arith.constant dense<0.000000e+00> : vector<8x128xf32>
    %124 = tpu.matmul %122, %123, %cst_41 {dimension_numbers = #tpu.dot_dimension_numbers<[1], [0], [0], [1], [0, 0, 1, 1], [], []>} : vector<8x128xf32>, vector<128x128xf32>, vector<8x128xf32> -> vector<8x128xf32>
    %125 = vector.extract_strided_slice %0 {offsets = [1, 0], sizes = [1, 128], strides = [1, 1]} : vector<16x128xf32> to vector<1x128xf32>
    %126 = vector.broadcast %125 : vector<1x128xf32> to vector<8x128xf32>
    %127 = arith.addf %124, %126 : vector<8x128xf32>
    %128 = arith.negf %127 : vector<8x128xf32>
    %129 = math.exp %128 : vector<8x128xf32>
    %cst_42 = arith.constant 1.000000e+00 : f32
    %130 = vector.broadcast %cst_42 : f32 to vector<8x128xf32>
    %131 = arith.addf %130, %129 : vector<8x128xf32>
    %132 = arith.divf %130, %131 : vector<8x128xf32>
    %133 = tpu.iota {dimensions = array<i32: 1>} : vector<8x128xi32>
    %c64_i32 = arith.constant 64 : i32
    %134 = vector.broadcast %c64_i32 : i32 to vector<8x128xi32>
    %135 = arith.cmpi slt, %133, %134 : vector<8x128xi32>
    %136 = arith.select %135, %132, %64 : vector<8x128xi1>, vector<8x128xf32>
    %c0_43 = arith.constant 0 : index
    %c0_44 = arith.constant 0 : index
    %137 = vector.load %arg2[%c0_43, %c0_44] : memref<8x128xf32, #tpu.memory_space<vmem>>, vector<8x128xf32>
    tpu.vector_store %arg2[%c0_43, %c0_44], %136 {strides = array<i32>} : memref<8x128xf32, #tpu.memory_space<vmem>>, vector<8x128xf32>,
    return
  }
}

</mosaic_0001>

<bundles_post_ra>
// kernel: tpu_custom_call.1
= control target key start
LH: loop header
LB: loop body
LE: loop exit
PB: predicated region body
PF: predicated region fallthrough
CT: control target
= control target key end

     0   :  { %7 = vsyncpa [#allocation3], 0  ;;  %s632_s0 = inlined_call_operand.hbm [shape: f32[8,128], index: 0, kind: input, shape index: {}]   ;;  %s633_s1 = inlined_call_operand.hbm [shape: f32[784,128], index: 1, kind: input, shape index: {}]   ;;  %s634_s2 = inlined_call_operand.hbm [shape: f32[8,128], index: 2, kind: output, shape index: {}]  }
   0x1   :  { %8 = vsyncpa [#allocation6], 0 }
   0x2   :  { %9 = vsyncpa [#allocation4], 0  ;;  %s15_s11 = sshll.u32 %s632_s0, 4  ;;  %s571_s12 = smov [#allocation2]   ;;  %s16_s11 = int_to_ptr.hbm [resolvable:$true] %s15_s11 }
   0x3   :  { %s17_s13 = sshll.u32 %s571_s12, 4  ;;  %s25_s16 = sshll.u32 %s633_s1, 4  ;;  %s18_s13 = int_to_ptr.vmem [resolvable:$true] %s17_s13  ;;  %s26_s16 = int_to_ptr.hbm [resolvable:$true] %s25_s16 }
   0x4   :  { %20 = dma.hbm_to_vmem [thread:$0]  %s16_s11, 128, %s18_s13, [#allocation3]  }
   0x5   :  { %s572_s17 = smov [#allocation5]   ;;  %s573_s19 = smov 128  }
   0x6   :  { %s27_s18 = sshll.u32 %s572_s17, 4  ;;  %s574_s20 = smov 8   ;;  %s28_s18 = int_to_ptr.vmem [resolvable:$true] %s27_s18 }
   0x7   :  { %33 = dma.hbm_to_vmem [thread:$0]  %s26_s16, 12544, %s28_s18, [#allocation6], %s573_s19, %s573_s19, %s574_s20  }
   0x8   :  { %565 = dma.done.wait [#allocation3], 128  }
   0x9   :  { %566 = vsyncadd [#allocation3], 4294967168 }
   0xa   :  { %567 = dma.done.wait [#allocation6], 12544  }
   0xb   :  { %568 = vsyncadd [#allocation6], 4294954752  ;;  %v60_v0 = vld [vmem:[#allocation5 + $0x78] sm:$0xff]  ;;  %v59_v1 = vld [vmem:[#allocation5 + $0x70] sm:$0xff]  ;;  %v575_v19 = vmov 8.0   ;;  %s576_s0 = smov [#allocation7]  }
   0xc   :  { %61 = vmatpush.msra.mxu0 %v60_v0  ;;  %v58_v2 = vld [vmem:[#allocation5 + $0x68] sm:$0xff]  ;;  %v57_v3 = vld [vmem:[#allocation5 + $0x60] sm:$0xff]  ;;  %v56_v4 = vld [vmem:[#allocation5 + $0x58] sm:$0xff]  ;;  %479 = vrcp.f32 %v575_v19  ;;  %s459_s1 = sshll.u32 %s576_s0, 4  ;;  %s461_s23 = sshll.u32 %s634_s2, 4  ;;  %s460_s1 = int_to_ptr.vmem [resolvable:$true] %s459_s1  ;;  %s462_s23 = int_to_ptr.hbm [resolvable:$true] %s461_s23 }
   0xd   :  { %v55_v5 = vld [vmem:[#allocation5 + $0x50] sm:$0xff]  ;;  %v54_v6 = vld [vmem:[#allocation5 + $0x48] sm:$0xff]  ;;  %v53_v7 = vld [vmem:[#allocation5 + $0x40] sm:$0xff] }
   0xe   :  { %62 = vmatpush.msra.mxu0 %v59_v1  ;;  %v52_v8 = vld [vmem:[#allocation5 + $0x38] sm:$0xff]  ;;  %v51_v9 = vld [vmem:[#allocation5 + $0x30] sm:$0xff]  ;;  %v50_v10 = vld [vmem:[#allocation5 + $0x28] sm:$0xff] }
   0xf   :  { %v49_v11 = vld [vmem:[#allocation5 + $0x20] sm:$0xff]  ;;  %v48_v12 = vld [vmem:[#allocation5 + $0x18] sm:$0xff]  ;;  %v47_v13 = vld [vmem:[#allocation5 + $0x10] sm:$0xff] }
  0x10   :  { %63 = vmatpush.msra.mxu0 %v58_v2  ;;  %v46_v14 = vld [vmem:[#allocation5 + $0x8] sm:$0xff]  ;;  %v45_v15 = vld [vmem:[#allocation5] sm:$0xff]  ;;  %v44_v16 = vld [vmem:[#allocation2] sm:$0xff] }
  0x11   :  { %v143_v17 = vld [vmem:[#allocation5 + $0xf8] sm:$0xff]  ;;  %v142_v18 = vld [vmem:[#allocation5 + $0xf0] sm:$0xff]  ;;  %v141_v20 = vld [vmem:[#allocation5 + $0xe8] sm:$0xff] }
  0x12   :  { %64 = vmatpush.msra.mxu0 %v57_v3  ;;  %144 = vmatpush.msra.mxu1 %v143_v17  ;;  %v140_v21 = vld [vmem:[#allocation5 + $0xe0] sm:$0xff]  ;;  %v139_v22 = vld [vmem:[#allocation5 + $0xd8] sm:$0xff]  ;;  %v480_v23 = vpop.eup %479  ;;  %v138_v24 = vld [vmem:[#allocation5 + $0xd0] sm:$0xff] }
  0x13   :  { %v137_v25 = vld [vmem:[#allocation5 + $0xc8] sm:$0xff]  ;;  %v88_v26 = vmul.f32 8.0, %v480_v23  ;;  %v136_v27 = vld [vmem:[#allocation5 + $0xc0] sm:$0xff]  ;;  %v135_v28 = vld [vmem:[#allocation5 + $0xb8] sm:$0xff]  ;;  %vm92_vm0 = vweird.f32 %v480_v23 }
  0x14   :  { %65 = vmatpush.msra.mxu0 %v56_v4  ;;  %145 = vmatpush.msra.mxu1 %v142_v18  ;;  %v134_v30 = vld [vmem:[#allocation5 + $0xb0] sm:$0xff]  ;;  %v133_v34 = vld [vmem:[#allocation5 + $0xa8] sm:$0xff]  ;;  %v132_v38 = vld [vmem:[#allocation5 + $0xa0] sm:$0xff] }
  0x15   :  { %v89_v29 = vsub.f32 1.0, %v88_v26  ;;  %v131_v41 = vld [vmem:[#allocation5 + $0x98] sm:$0xff]  ;;  %v130_v45 = vld [vmem:[#allocation5 + $0x90] sm:$0xff]  ;;  %v129_v48 = vld [vmem:[#allocation5 + $0x88] sm:$0xff] }
  0x16   :  { %66 = vmatpush.msra.mxu0 %v55_v5  ;;  %146 = vmatpush.msra.mxu1 %v141_v20  ;;  %v128_v52 = vld [vmem:[#allocation5 + $0x80] sm:$0xff]  ;;  %v215_v17 = vld [vmem:[#allocation5 + $0x158] sm:$0xff]  ;;  %v214_v18 = vld [vmem:[#allocation5 + $0x150] sm:$0xff] }
  0x17   :  { %v90_v35 = vmul.f32 %v480_v23, %v89_v29  ;;  %v602_v1 = vld [vmem:[#allocation5 + $0x300] sm:$0xff]  ;;  %v213_v19 = vld [vmem:[#allocation5 + $0x148] sm:$0xff] }
  0x18   :  { %67 = vmatpush.msra.mxu0 %v54_v6  ;;  %147 = vmatpush.msra.mxu1 %v140_v21  ;;  %v212_v20 = vld [vmem:[#allocation5 + $0x140] sm:$0xff]  ;;  %v211_v21 = vld [vmem:[#allocation5 + $0x138] sm:$0xff]  ;;  %v209_v26 = vld [vmem:[#allocation5 + $0x128] sm:$0xff] }
  0x19   :  { %v91_v42 = vadd.f32 %v480_v23, %v90_v35  ;;  %v208_v29 = vld [vmem:[#allocation5 + $0x120] sm:$0xff]  ;;  %v206_v35 = vld [vmem:[#allocation5 + $0x110] sm:$0xff] }
  0x1a   :  { %68 = vmatpush.msra.mxu0 %v53_v7  ;;  %148 = vmatpush.msra.mxu1 %v139_v22  ;;  %v210_v22 = vld [vmem:[#allocation5 + $0x130] sm:$0xff] }
  0x1b   :  { %v598_v49 = vsel %vm92_vm0, %v480_v23, %v91_v42 }
  0x1c   :  { %69 = vmatpush.msra.mxu0 %v52_v8  ;;  %149 = vmatpush.msra.mxu1 %v138_v24 }
  0x1e   :  { %70 = vmatpush.msra.mxu0 %v51_v9  ;;  %150 = vmatpush.msra.mxu1 %v137_v25 }
  0x20   :  { %71 = vmatpush.msra.mxu0 %v50_v10  ;;  %151 = vmatpush.msra.mxu1 %v136_v27 }
  0x22   :  { %72 = vmatpush.msra.mxu0 %v49_v11  ;;  %152 = vmatpush.msra.mxu1 %v135_v28 }
  0x24   :  { %73 = vmatpush.msra.mxu0 %v48_v12  ;;  %153 = vmatpush.msra.mxu1 %v134_v30 }
  0x26   :  { %74 = vmatpush.msra.mxu0 %v47_v13  ;;  %154 = vmatpush.msra.mxu1 %v133_v34  ;;  %v219_v13 = vld [vmem:[#allocation5 + $0x178] sm:$0xff] }
  0x27   :  { %221 = vmatpush.msra.mxu2 %v219_v13 }
  0x28   :  { %75 = vmatpush.msra.mxu0 %v46_v14  ;;  %155 = vmatpush.msra.mxu1 %v132_v38  ;;  %v218_v14 = vld [vmem:[#allocation5 + $0x170] sm:$0xff]  ;;  %v205_v38 = vld [vmem:[#allocation5 + $0x108] sm:$0xff] }
  0x29   :  { %222 = vmatpush.msra.mxu2 %v218_v14 }
  0x2a   :  { %76 = vmatpush.msra.mxu0 %v45_v15  ;;  %156 = vmatpush.msra.mxu1 %v131_v41  ;;  %v217_v15 = vld [vmem:[#allocation5 + $0x168] sm:$0xff]  ;;  %v204_v41 = vld [vmem:[#allocation5 + $0x100] sm:$0xff] }
  0x2b   :  { %77 = vmatmul.f32.vlgmr.msra.gmra.mxu0 %v44_v16  ;;  %v216_v16 = vld [vmem:[#allocation5 + $0x160] sm:$0xff]  ;;  %223 = vmatpush.msra.mxu2 %v217_v15 }
  0x2c   :  { %157 = vmatpush.msra.mxu1 %v130_v45 }
  0x2d   :  { %224 = vmatpush.msra.mxu2 %v216_v16 }
  0x2e   :  { %158 = vmatpush.msra.mxu1 %v129_v48 }
  0x2f   :  { %225 = vmatpush.msra.mxu2 %v215_v17  ;;  %v242_v17 = vld [vmem:[#allocation5 + $0x188] sm:$0xff] }
  0x30   :  { %159 = vmatpush.msra.mxu1 %v128_v52  ;;  %v254_v52 = vld [vmem:[#allocation5 + $0x1e8] sm:$0xff] }
  0x31   :  { %226 = vmatpush.msra.mxu2 %v214_v18  ;;  %v241_v18 = vld [vmem:[#allocation5 + $0x180] sm:$0xff] }
  0x33   :  { %227 = vmatpush.msra.mxu2 %v213_v19  ;;  %v220_v19 = vperm.slane %v602_v1, 0 }
  0x35   :  { %228 = vmatpush.msra.mxu2 %v212_v20 }
  0x37   :  { %229 = vmatpush.msra.mxu2 %v211_v21 }
  0x39   :  { %230 = vmatpush.msra.mxu2 %v210_v22  ;;  %v332_v22 = vld [vmem:[#allocation5 + $0x278] sm:$0xff] }
  0x3a   :  { %333 = vmatpush.msrb.mxu0 %v332_v22 }
  0x3b   :  { %231 = vmatpush.msra.mxu2 %v209_v26  ;;  %v328_v26 = vld [vmem:[#allocation5 + $0x258] sm:$0xff] }
  0x3d   :  { %232 = vmatpush.msra.mxu2 %v208_v29 }
  0xa8   :  { %v78_v31 = vpop.f32.mrf.mxu0 }
  0xa9   :  { %v81_v32 = vrot.slane %v78_v31, 4  ;;  %v95_v33 = vmul.f32 %v78_v31, %v78_v31 }
  0xab   :  { %v82_v36 = vadd.f32 %v81_v32, %v78_v31  ;;  %v96_v37 = vrot.slane %v95_v33, 4  ;;  %v207_v32 = vld [vmem:[#allocation5 + $0x118] sm:$0xff] }
  0xac   :  { %233 = vmatpush.msra.mxu2 %v207_v32 }
  0xad   :  { %v83_v39 = vrot.slane %v82_v36, 2  ;;  %v97_v40 = vadd.f32 %v96_v37, %v95_v33 }
  0xae   :  { %234 = vmatpush.msra.mxu2 %v206_v35 }
  0xaf   :  { %v84_v43 = vadd.f32 %v83_v39, %v82_v36  ;;  %v98_v44 = vrot.slane %v97_v40, 2 }
  0xb0   :  { %235 = vmatpush.msra.mxu2 %v205_v38 }
  0xb1   :  { %v85_v46 = vrot.slane %v84_v43, 1  ;;  %v99_v47 = vadd.f32 %v98_v44, %v97_v40 }
  0xb2   :  { %236 = vmatpush.msra.mxu2 %v204_v41 }
  0xb3   :  { %v86_v50 = vadd.f32 %v85_v46, %v84_v43  ;;  %v100_v51 = vrot.slane %v99_v47, 1 }
  0xb5   :  { %v101_v53 = vadd.f32 %v100_v51, %v99_v47  ;;  %v94_v54 = vmul.f32 %v598_v49, %v86_v50  ;;  %v256_v50 = vld [vmem:[#allocation5 + $0x1f8] sm:$0xff]  ;;  %v255_v51 = vld [vmem:[#allocation5 + $0x1f0] sm:$0xff] }
  0xb6   :  { %257 = vmatpush.msra.mxu3 %v256_v50  ;;  %v320_v50 = vld [vmem:[#allocation5 + $0x218] sm:$0xff] }
  0xb7   :  { %v102_v55 = vmul.f32 %v101_v53, %v598_v49  ;;  %v103_v56 = vmul.f32 %v94_v54, %v94_v54  ;;  %v253_v53 = vld [vmem:[#allocation5 + $0x1e0] sm:$0xff] }
  0xb8   :  { %258 = vmatpush.msra.mxu3 %v255_v51 }
  0xb9   :  { %v104_v57 = vsub.f32 %v102_v55, %v103_v56  ;;  %v252_v55 = vld [vmem:[#allocation5 + $0x1d8] sm:$0xff] }
  0xba   :  { %259 = vmatpush.msra.mxu3 %v254_v52 }
  0xbb   :  { %v105_v58 = vmax.f32 %v104_v57, 0.0  ;;  %v251_v57 = vld [vmem:[#allocation5 + $0x1d0] sm:$0xff] }
  0xbc   :  { %260 = vmatpush.msra.mxu3 %v253_v53  ;;  %v319_v53 = vld [vmem:[#allocation5 + $0x210] sm:$0xff] }
  0xbd   :  { %v106_v59 = vadd.f32 1e-05, %v105_v58 }
  0xbe   :  { %261 = vmatpush.msra.mxu3 %v252_v55  ;;  %v318_v55 = vld [vmem:[#allocation5 + $0x208] sm:$0xff] }
  0xbf   :  { %481 = vrsqrt.f32 %v106_v59  ;;  %vm113_vm2 = vweird.f32 %v106_v59 }
  0xc0   :  { %262 = vmatpush.msra.mxu3 %v251_v57  ;;  %v317_v57 = vld [vmem:[#allocation5 + $0x200] sm:$0xff] }
  0xc5   :  { %v482_v60 = vpop.eup %481 }
  0xc6   :  { %v108_v61 = vmul.f32 %v482_v60, %v106_v59  ;;  %vm114_vm1 = vweird.f32 %v482_v60  ;;  %v250_v59 = vld [vmem:[#allocation5 + $0x1c8] sm:$0xff] }
  0xc7   :  { %vm115_vm3 = vmor %vm113_vm2, %vm114_vm1  ;;  %263 = vmatpush.msra.mxu3 %v250_v59 }
  0xc8   :  { %v109_v62 = vmul.f32 %v482_v60, %v108_v61  ;;  %v249_v61 = vld [vmem:[#allocation5 + $0x1c0] sm:$0xff] }
  0xc9   :  { %264 = vmatpush.msra.mxu3 %v249_v61 }
  0xca   :  { %v110_v63 = vmul.f32 0.5, %v109_v62 }
  0xcc   :  { %v111_v0 = vsub.f32 1.5, %v110_v63  ;;  %v248_v63 = vld [vmem:[#allocation5 + $0x1b8] sm:$0xff] }
  0xcd   :  { %265 = vmatpush.msra.mxu3 %v248_v63 }
  0xce   :  { %v112_v2 = vmul.f32 %v482_v60, %v111_v0 }
  0xd0   :  { %v116_v3 = vsel %vm115_vm3, %v482_v60, %v112_v2  ;;  %v247_v2 = vld [vmem:[#allocation5 + $0x1b0] sm:$0xff] }
  0xd1   :  { %v117_v4 = vmul.f32 %v116_v3, %v602_v1  ;;  %266 = vmatpush.msra.mxu3 %v247_v2 }
  0xd3   :  { %v118_v5 = vmul.f32 %v117_v4, %v94_v54  ;;  %v123_v7 = vperm.slane %v117_v4, 2 }
  0xd5   :  { %v120_v6 = vrot.slane %v118_v5, 7  ;;  %v124_v9 = vmul.f32 %v123_v7, %v78_v31  ;;  %v246_v5 = vld [vmem:[#allocation5 + $0x1a8] sm:$0xff]  ;;  %v245_v7 = vld [vmem:[#allocation5 + $0x1a0] sm:$0xff] }
  0xd6   :  { %267 = vmatpush.msra.mxu3 %v246_v5 }
  0xd7   :  { %v122_v8 = vsub.f32 %v602_v1, %v120_v6 }
  0xd8   :  { %268 = vmatpush.msra.mxu3 %v245_v7 }
  0xd9   :  { %v125_v10 = vperm.slane %v122_v8, 3 }
  0xdb   :  { %v126_v11 = vadd.f32 %v125_v10, %v124_v9  ;;  %v244_v10 = vld [vmem:[#allocation5 + $0x198] sm:$0xff] }
  0xdc   :  { %269 = vmatpush.msra.mxu3 %v244_v10 }
  0xdd   :  { %v127_v12 = vmax.f32 %v126_v11, 0.0 }
  0xdf   :  { %160 = vmatmul.f32.vlgmr.msra.gmra.mxu1 %v127_v12  ;;  %v243_v12 = vld [vmem:[#allocation5 + $0x190] sm:$0xff] }
  0xe0   :  { %270 = vmatpush.msra.mxu3 %v243_v12  ;;  %v408_v12 = vld [vmem:[#allocation5 + $0x2f8] sm:$0xff] }
  0xe1   :  { %410 = vmatpush.msrb.mxu1 %v408_v12 }
  0xe2   :  { %271 = vmatpush.msra.mxu3 %v242_v17 }
  0xe4   :  { %272 = vmatpush.msra.mxu3 %v241_v18 }
 0x15c   :  { %v606_v23 = vpop.f32.mrf.mxu1 }
 0x15d   :  { %v164_v24 = vrot.slane %v606_v23, 4  ;;  %v171_v25 = vmul.f32 %v606_v23, %v606_v23 }
 0x15f   :  { %v165_v27 = vadd.f32 %v164_v24, %v606_v23  ;;  %v172_v28 = vrot.slane %v171_v25, 4  ;;  %v331_v24 = vld [vmem:[#allocation5 + $0x270] sm:$0xff] }
 0x160   :  { %334 = vmatpush.msrb.mxu0 %v331_v24 }
 0x161   :  { %v166_v30 = vrot.slane %v165_v27, 2  ;;  %v173_v31 = vadd.f32 %v172_v28, %v171_v25  ;;  %v329_v25 = vld [vmem:[#allocation5 + $0x260] sm:$0xff] }
 0x163   :  { %v167_v33 = vadd.f32 %v166_v30, %v165_v27  ;;  %v174_v34 = vrot.slane %v173_v31, 2  ;;  %v327_v30 = vld [vmem:[#allocation5 + $0x250] sm:$0xff] }
 0x165   :  { %v168_v36 = vrot.slane %v167_v33, 1  ;;  %v175_v37 = vadd.f32 %v174_v34, %v173_v31 }
 0x167   :  { %v169_v39 = vadd.f32 %v168_v36, %v167_v33  ;;  %v176_v40 = vrot.slane %v175_v37, 1  ;;  %v326_v33 = vld [vmem:[#allocation5 + $0x248] sm:$0xff]  ;;  %v325_v36 = vld [vmem:[#allocation5 + $0x240] sm:$0xff] }
 0x169   :  { %v177_v42 = vadd.f32 %v176_v40, %v175_v37  ;;  %v170_v43 = vmul.f32 %v169_v39, %v598_v49  ;;  %v324_v39 = vld [vmem:[#allocation5 + $0x238] sm:$0xff] }
 0x16b   :  { %v178_v44 = vmul.f32 %v177_v42, %v598_v49  ;;  %v179_v45 = vmul.f32 %v170_v43, %v170_v43  ;;  %v323_v42 = vld [vmem:[#allocation5 + $0x230] sm:$0xff] }
 0x16d   :  { %v180_v46 = vsub.f32 %v178_v44, %v179_v45  ;;  %v322_v45 = vld [vmem:[#allocation5 + $0x228] sm:$0xff] }
 0x16f   :  { %v181_v47 = vmax.f32 %v180_v46, 0.0 }
 0x171   :  { %v182_v48 = vadd.f32 1e-05, %v181_v47 }
 0x173   :  { %483 = vrsqrt.f32 %v182_v48  ;;  %vm189_vm5 = vweird.f32 %v182_v48 }
 0x179   :  { %v484_v54 = vpop.eup %483 }
 0x17a   :  { %v184_v56 = vmul.f32 %v484_v54, %v182_v48  ;;  %vm190_vm4 = vweird.f32 %v484_v54  ;;  %v321_v48 = vld [vmem:[#allocation5 + $0x220] sm:$0xff] }
 0x17b   :  { %vm191_vm6 = vmor %vm189_vm5, %vm190_vm4 }
 0x17c   :  { %v185_v58 = vmul.f32 %v484_v54, %v184_v56 }
 0x17e   :  { %v186_v60 = vmul.f32 0.5, %v185_v58 }
 0x180   :  { %v187_v62 = vsub.f32 1.5, %v186_v60 }
 0x182   :  { %v188_v0 = vmul.f32 %v484_v54, %v187_v62 }
 0x184   :  { %v192_v3 = vsel %vm191_vm6, %v484_v54, %v188_v0 }
 0x185   :  { %v193_v4 = vmul.f32 %v192_v3, %v602_v1 }
 0x187   :  { %v194_v6 = vmul.f32 %v193_v4, %v170_v43  ;;  %v199_v9 = vperm.slane %v193_v4, 4 }
 0x189   :  { %v196_v8 = vrot.slane %v194_v6, 7  ;;  %v200_v13 = vmul.f32 %v199_v9, %v606_v23  ;;  %v330_v23 = vld [vmem:[#allocation5 + $0x268] sm:$0xff] }
 0x18a   :  { %335 = vmatpush.msrb.mxu0 %v330_v23  ;;  %v402_v23 = vld [vmem:[#allocation5 + $0x2c8] sm:$0xff] }
 0x18b   :  { %v198_v11 = vsub.f32 %v602_v1, %v196_v8 }
 0x18c   :  { %336 = vmatpush.msrb.mxu0 %v329_v25 }
 0x18d   :  { %v201_v14 = vperm.slane %v198_v11, 5 }
 0x18e   :  { %337 = vmatpush.msrb.mxu0 %v328_v26 }
 0x18f   :  { %v202_v15 = vadd.f32 %v201_v14, %v200_v13  ;;  %v407_v13 = vld [vmem:[#allocation5 + $0x2f0] sm:$0xff]  ;;  %v406_v14 = vld [vmem:[#allocation5 + $0x2e8] sm:$0xff] }
 0x190   :  { %338 = vmatpush.msrb.mxu0 %v327_v30  ;;  %411 = vmatpush.msrb.mxu1 %v407_v13  ;;  %v400_v30 = vld [vmem:[#allocation5 + $0x2b8] sm:$0xff] }
 0x191   :  { %v203_v16 = vmax.f32 %v202_v15, 0.0  ;;  %v405_v15 = vld [vmem:[#allocation5 + $0x2e0] sm:$0xff] }
 0x192   :  { %339 = vmatpush.msrb.mxu0 %v326_v33  ;;  %412 = vmatpush.msrb.mxu1 %v406_v14  ;;  %v399_v33 = vld [vmem:[#allocation5 + $0x2b0] sm:$0xff] }
 0x193   :  { %237 = vmatmul.f32.vlgmr.msra.gmra.mxu2 %v203_v16  ;;  %v404_v16 = vld [vmem:[#allocation5 + $0x2d8] sm:$0xff] }
 0x194   :  { %340 = vmatpush.msrb.mxu0 %v325_v36  ;;  %413 = vmatpush.msrb.mxu1 %v405_v15  ;;  %v398_v36 = vld [vmem:[#allocation5 + $0x2a8] sm:$0xff] }
 0x196   :  { %341 = vmatpush.msrb.mxu0 %v324_v39  ;;  %414 = vmatpush.msrb.mxu1 %v404_v16  ;;  %v397_v39 = vld [vmem:[#allocation5 + $0x2a0] sm:$0xff] }
 0x198   :  { %342 = vmatpush.msrb.mxu0 %v323_v42 }
 0x19a   :  { %343 = vmatpush.msrb.mxu0 %v322_v45  ;;  %v394_v45 = vld [vmem:[#allocation5 + $0x288] sm:$0xff] }
 0x19c   :  { %344 = vmatpush.msrb.mxu0 %v321_v48 }
 0x19e   :  { %345 = vmatpush.msrb.mxu0 %v320_v50 }
 0x1a0   :  { %346 = vmatpush.msrb.mxu0 %v319_v53 }
 0x1a2   :  { %347 = vmatpush.msrb.mxu0 %v318_v55  ;;  %v43_v55 = vld [vmem:[#allocation5 + $0x308] sm:$0xff] }
 0x1a4   :  { %348 = vmatpush.msrb.mxu0 %v317_v57 }
 0x216   :  { %v238_v20 = vpop.f32.mrf.mxu2 }
 0x217   :  { %v618_v21 = vadd.f32 %v238_v20, %v220_v19  ;;  %v403_v20 = vld [vmem:[#allocation5 + $0x2d0] sm:$0xff] }
 0x218   :  { %415 = vmatpush.msrb.mxu1 %v403_v20 }
 0x219   :  { %273 = vmatmul.f32.vlgmr.msra.gmra.mxu3 %v618_v21 }
 0x21a   :  { %416 = vmatpush.msrb.mxu1 %v402_v23 }
 0x29c   :  { %v274_v27 = vpop.f32.mrf.mxu3 }
 0x29d   :  { %v277_v28 = vrot.slane %v274_v27, 4  ;;  %v284_v29 = vmul.f32 %v274_v27, %v274_v27 }
 0x29f   :  { %v278_v31 = vadd.f32 %v277_v28, %v274_v27  ;;  %v285_v32 = vrot.slane %v284_v29, 4 }
 0x2a1   :  { %v279_v34 = vrot.slane %v278_v31, 2  ;;  %v286_v35 = vadd.f32 %v285_v32, %v284_v29 }
 0x2a3   :  { %v280_v37 = vadd.f32 %v279_v34, %v278_v31  ;;  %v287_v38 = vrot.slane %v286_v35, 2 }
 0x2a5   :  { %v281_v40 = vrot.slane %v280_v37, 1  ;;  %v288_v41 = vadd.f32 %v287_v38, %v286_v35 }
 0x2a7   :  { %v282_v43 = vadd.f32 %v281_v40, %v280_v37  ;;  %v289_v44 = vrot.slane %v288_v41, 1  ;;  %v396_v40 = vld [vmem:[#allocation5 + $0x298] sm:$0xff] }
 0x2a9   :  { %v283_v46 = vmul.f32 %v282_v43, %v598_v49  ;;  %v290_v47 = vadd.f32 %v289_v44, %v288_v41  ;;  %v395_v43 = vld [vmem:[#allocation5 + $0x290] sm:$0xff] }
 0x2ab   :  { %v291_v51 = vmul.f32 %v290_v47, %v598_v49  ;;  %v292_v52 = vmul.f32 %v283_v46, %v283_v46  ;;  %v393_v47 = vld [vmem:[#allocation5 + $0x280] sm:$0xff] }
 0x2ad   :  { %v293_v54 = vsub.f32 %v291_v51, %v292_v52 }
 0x2af   :  { %v294_v56 = vmax.f32 %v293_v54, 0.0 }
 0x2b1   :  { %v295_v58 = vadd.f32 1e-05, %v294_v56 }
 0x2b3   :  { %485 = vrsqrt.f32 %v295_v58  ;;  %vm302_vm8 = vweird.f32 %v295_v58 }
 0x2b9   :  { %v486_v59 = vpop.eup %485 }
 0x2ba   :  { %v297_v60 = vmul.f32 %v486_v59, %v295_v58  ;;  %vm303_vm7 = vweird.f32 %v486_v59 }
 0x2bb   :  { %vm304_vm9 = vmor %vm302_vm8, %vm303_vm7 }
 0x2bc   :  { %v298_v61 = vmul.f32 %v486_v59, %v297_v60 }
 0x2be   :  { %v299_v62 = vmul.f32 0.5, %v298_v61 }
 0x2c0   :  { %v300_v63 = vsub.f32 1.5, %v299_v62 }
 0x2c2   :  { %v301_v0 = vmul.f32 %v486_v59, %v300_v63 }
 0x2c4   :  { %v305_v2 = vsel %vm304_vm9, %v486_v59, %v301_v0 }
 0x2c5   :  { %v306_v3 = vmul.f32 %v305_v2, %v602_v1 }
 0x2c7   :  { %v307_v4 = vmul.f32 %v306_v3, %v283_v46  ;;  %v312_v5 = vperm.slane %v306_v3, 6  ;;  %v409_v3 = vperm.slane %v602_v1, 1 }
 0x2c9   :  { %v309_v6 = vrot.slane %v307_v4, 7  ;;  %v313_v8 = vmul.f32 %v312_v5, %v274_v27  ;;  %v401_v27 = vld [vmem:[#allocation5 + $0x2c0] sm:$0xff] }
 0x2ca   :  { %417 = vmatpush.msrb.mxu1 %v401_v27 }
 0x2cb   :  { %v311_v7 = vsub.f32 %v602_v1, %v309_v6 }
 0x2cc   :  { %418 = vmatpush.msrb.mxu1 %v400_v30 }
 0x2cd   :  { %v314_v9 = vperm.slane %v311_v7, 7 }
 0x2ce   :  { %419 = vmatpush.msrb.mxu1 %v399_v33 }
 0x2cf   :  { %v315_v10 = vadd.f32 %v314_v9, %v313_v8 }
 0x2d0   :  { %420 = vmatpush.msrb.mxu1 %v398_v36 }
 0x2d1   :  { %v316_v11 = vmax.f32 %v315_v10, 0.0  ;;  %v449_v10 = vlaneseq }
 0x2d2   :  { %421 = vmatpush.msrb.mxu1 %v397_v39 }
 0x2d3   :  { %349 = vmatmul.f32.vlgmr.msrb.gmra.mxu0 %v316_v11  ;;  %v450_v14 = vand.u32 127, %v449_v10 }
 0x2d4   :  { %422 = vmatpush.msrb.mxu1 %v396_v40 }
 0x2d5   :  { %vm451_vm0 = vcmp.lt.s32.totalorder %v450_v14, 64 }
 0x2d6   :  { %423 = vmatpush.msrb.mxu1 %v395_v43 }
 0x2d8   :  { %424 = vmatpush.msrb.mxu1 %v394_v45 }
 0x2da   :  { %425 = vmatpush.msrb.mxu1 %v393_v47 }
 0x350   :  { %v350_v17 = vpop.f32.mrf.mxu0 }
 0x351   :  { %v353_v18 = vrot.slane %v350_v17, 4  ;;  %v360_v19 = vmul.f32 %v350_v17, %v350_v17 }
 0x353   :  { %v354_v22 = vadd.f32 %v353_v18, %v350_v17  ;;  %v361_v24 = vrot.slane %v360_v19, 4 }
 0x355   :  { %v355_v25 = vrot.slane %v354_v22, 2  ;;  %v362_v26 = vadd.f32 %v361_v24, %v360_v19 }
 0x357   :  { %v356_v28 = vadd.f32 %v355_v25, %v354_v22  ;;  %v363_v29 = vrot.slane %v362_v26, 2 }
 0x359   :  { %v357_v31 = vrot.slane %v356_v28, 1  ;;  %v364_v32 = vadd.f32 %v363_v29, %v362_v26 }
 0x35b   :  { %v358_v34 = vadd.f32 %v357_v31, %v356_v28  ;;  %v365_v35 = vrot.slane %v364_v32, 1 }
 0x35d   :  { %v359_v37 = vmul.f32 %v358_v34, %v598_v49  ;;  %v366_v38 = vadd.f32 %v365_v35, %v364_v32 }
 0x35f   :  { %v367_v41 = vmul.f32 %v366_v38, %v598_v49  ;;  %v368_v42 = vmul.f32 %v359_v37, %v359_v37 }
 0x361   :  { %v369_v44 = vsub.f32 %v367_v41, %v368_v42 }
 0x363   :  { %v370_v46 = vmax.f32 %v369_v44, 0.0 }
 0x365   :  { %v371_v48 = vadd.f32 1e-05, %v370_v46 }
 0x367   :  { %487 = vrsqrt.f32 %v371_v48  ;;  %vm378_vm11 = vweird.f32 %v371_v48 }
 0x36d   :  { %v488_v50 = vpop.eup %487 }
 0x36e   :  { %v373_v51 = vmul.f32 %v488_v50, %v371_v48  ;;  %vm379_vm10 = vweird.f32 %v488_v50 }
 0x36f   :  { %vm380_vm12 = vmor %vm378_vm11, %vm379_vm10 }
 0x370   :  { %v374_v52 = vmul.f32 %v488_v50, %v373_v51 }
 0x372   :  { %v375_v53 = vmul.f32 0.5, %v374_v52 }
 0x374   :  { %v376_v54 = vsub.f32 1.5, %v375_v53 }
 0x376   :  { %v377_v49 = vmul.f32 %v488_v50, %v376_v54 }
 0x378   :  { %v381_v56 = vsel %vm380_vm12, %v488_v50, %v377_v49 }
 0x379   :  { %v382_v57 = vmul.f32 %v381_v56, %v43_v55 }
 0x37b   :  { %v383_v58 = vmul.f32 %v382_v57, %v359_v37  ;;  %v388_v59 = vperm.slane %v382_v57, 0 }
 0x37d   :  { %v385_v60 = vrot.slane %v383_v58, 7  ;;  %v389_v62 = vmul.f32 %v388_v59, %v350_v17 }
 0x37f   :  { %v387_v61 = vsub.f32 %v43_v55, %v385_v60 }
 0x381   :  { %v390_v63 = vperm.slane %v387_v61, 1 }
 0x383   :  { %v391_v0 = vadd.f32 %v390_v63, %v389_v62 }
 0x385   :  { %v392_v2 = vmax.f32 %v391_v0, 0.0 }
 0x387   :  { %426 = vmatmul.f32.vlgmr.msrb.gmra.mxu1 %v392_v2 }
 0x404   :  { %v427_v4 = vpop.f32.mrf.mxu1 }
 0x405   :  { %v428_v5 = vadd.f32 %v427_v4, %v409_v3 }
 0x407   :  { %v472_v6 = vmul.f32 -1.442695, %v428_v5 }
 0x409   :  { %489 = vpow2.f32 %v472_v6 }
 0x40f   :  { %v490_v7 = vpop.eup %489 }
 0x410   :  { %v433_v8 = vadd.f32 1.0, %v490_v7 }
 0x412   :  { %491 = vrcp.f32 %v433_v8  ;;  %v445_v13 = vand.u32 2147483648, %v433_v8  ;;  %v443_v16 = vand.u32 2147483647, %v433_v8  ;;  %vm439_vm14 = vweird.f32 %v433_v8 }
 0x414   :  { %v446_v1 = vor.u32 1.1754944e-38, %v445_v13  ;;  %vm444_vm1 = vcmp.eq.f32.partialorder %v443_v16, 8.507059e+37 }
 0x418   :  { %v492_v9 = vpop.eup %491 }
 0x419   :  { %v435_v11 = vmul.f32 %v492_v9, %v433_v8  ;;  %vm440_vm13 = vweird.f32 %v492_v9 }
 0x41a   :  { %vm441_vm15 = vmor %vm439_vm14, %vm440_vm13 }
 0x41b   :  { %v436_v12 = vsub.f32 1.0, %v435_v11 }
 0x41d   :  { %v437_v15 = vmul.f32 %v492_v9, %v436_v12 }
 0x41f   :  { %v438_v17 = vadd.f32 %v492_v9, %v437_v15 }
 0x421   :  { %v442_v18 = vsel %vm441_vm15, %v492_v9, %v438_v17 }
 0x422   :  { %v447_v19 = vsel %vm444_vm1, %v446_v1, %v442_v18 }
 0x423   :  { %v452_v20 = vsel %vm451_vm0, %v447_v19, %v618_v21 }
 0x424   :  { %453 = vst [vmem:[#allocation7] sm:$0xff] %v452_v20 }
 0x425   :  { %464 = dma.vmem_to_hbm [thread:$0]  %s460_s1, 128, %s462_s23, [#allocation4]  }
 0x426   :  { %569 = dma.done.wait [#allocation4], 128  }
 0x427   :  { %570 = vsyncadd [#allocation4], 4294967168 }
 0x428   :  { %469 = vsyncpa [#allocation3], 1 }
 0x429   :  { %470 = vsyncpa [#allocation6], 1 }
 0x42a   :  { %471 = vsyncpa [#allocation4], 1 }

</bundles_post_ra>
